<compile_context>
chip_gen: v6e
topology: v6e:2x2x1
jax: 0.10.0
libtpu: 0.0.40
codegen_flags: <defaults>
</compile_context>

<pallas_src>
import math

import numpy as np
import jax
import jax.numpy as jnp
from jax.experimental import pallas as pl
from jax.experimental.pallas import tpu as pltpu


def _round_up(x, m):
    return ((x + m - 1) // m) * m


def _cdiv(a, b):
    return -(-a // b)


# --------------------------- MSE reduction kernel ----------------------------
def _mse_partial_kernel(p_ref, t_ref, acc_ref):
    """Accumulates sum((p-t)^2) for one core into a resident (1,8,128) block."""
    @pl.when(pl.program_id(1) == 0)
    def _():
        acc_ref[...] = jnp.zeros_like(acc_ref)

    bb, lp = p_ref.shape
    part = None
    # Lane-group fold (static 128-wide slices, layout preserving) + sublane-group
    # fold (leading-axis reduce). Pure VPU work per step; no block->scalar reduce.
    for c in range(lp // 128):
        sl = slice(c * 128, (c + 1) * 128)
        d = p_ref[:, sl].astype(jnp.float32) - t_ref[:, sl].astype(jnp.float32)
        contrib = jnp.sum((d * d).reshape(bb // 8, 8, 128), axis=0)
        part = contrib if part is None else part + contrib
    acc_ref[...] += part[None, :, :]


def _mse_grid(B, L_pad, itemsize, target_bytes=4 << 20):
    """Pick (n_cores, n_inner, row_block) with row_block a multiple of 8,
    ~<= 4 MiB per-input tiles and minimal zero-padding waste."""
    bb_max = max(8, (target_bytes // max(L_pad * itemsize, 1)) // 8 * 8)
    bb_max = min(bb_max, _round_up(B, 8))
    n_cores = 2 if B > bb_max else 1          # v7x: split rows across both TCs
    rows_per_core = _round_up(_cdiv(B, n_cores), 8)
    n_inner = _cdiv(rows_per_core, bb_max)
    bb = _round_up(_cdiv(rows_per_core, n_inner), 8)
    return n_cores, n_inner, bb


def mse_loss_pallas(preds, target):
    B, L = preds.shape
    itemsize = preds.dtype.itemsize
    L_pad = _round_up(L, 128)
    n_cores, n_inner, bb = _mse_grid(B, L_pad, itemsize)
    B_pad = n_cores * n_inner * bb
    if (B_pad, L_pad) != (B, L):
        pad = ((0, B_pad - B), (0, L_pad - L))
        preds = jnp.pad(preds, pad)      # zero pad on BOTH -> zero contribution
        target = jnp.pad(target, pad)

    partials = pl.pallas_call(
        _mse_partial_kernel,
        out_shape=jax.ShapeDtypeStruct((n_cores, 8, 128), jnp.float32),
        grid_spec=pltpu.PrefetchScalarGridSpec(
            num_scalar_prefetch=0,
            grid=(n_cores, n_inner),
            in_specs=[
                pl.BlockSpec((bb, L_pad), lambda c, i: (c * n_inner + i, 0)),
                pl.BlockSpec((bb, L_pad), lambda c, i: (c * n_inner + i, 0)),
            ],
            out_specs=pl.BlockSpec((1, 8, 128), lambda c, i: (c, 0, 0)),
        ),
        compiler_params=pltpu.CompilerParams(
            dimension_semantics=("parallel", "arbitrary"),
            vmem_limit_bytes=32 * 1024 * 1024),
    )(preds, target)
    return jnp.sum(partials) / jnp.float32(B * L)


# --------------------------- alias / tightness kernel ------------------------
def _make_alias_kernel(d, Ls, n_terms):
    # Plain Python floats -> literal constants (fixes the captured-constant error).
    inv_d = 1.0 / float(d)
    inv_ls = 1.0 / float(Ls)

    def kernel(wr_ref, wi_ref, r_ref, g_ref):
        @pl.when(pl.program_id(0) == 0)
        def _():
            g_ref[...] = jnp.zeros_like(g_ref)
            r_ref[...] = jnp.zeros_like(r_ref)

        wr = wr_ref[...]                               # [Mt, Ls] real(FFT)
        wi = wi_ref[...]                               # [Mt, Ls] imag(FFT)
        mt = wr.shape[0]
        ones = jnp.ones((1, mt), jnp.float32)          # MXU reduction vector (hoisted)

        # j = 0: frame-operator diagonal partial (sum over this filter tile), MXU.
        g_ref[0:1, :] += jnp.dot(ones, wr * wr + wi * wi,
                                 preferred_element_type=jnp.float32)

        # j != 0 aliasing terms: circular frequency shift on the XLU, sum on MXU.
        for j in range(1, n_terms):
            s = (j * Ls) // d
            wr_s = pltpu.roll(wr, shift=s, axis=1)
            wi_s = pltpu.roll(wi, shift=s, axis=1)
            g_ref[2 * j - 1:2 * j, :] += jnp.dot(
                ones, wr * wr_s + wi * wi_s, preferred_element_type=jnp.float32)
            g_ref[2 * j:2 * j + 1, :] += jnp.dot(
                ones, wi * wr_s - wr * wi_s, preferred_element_type=jnp.float32)

        @pl.when(pl.program_id(0) == pl.num_programs(0) - 1)
        def _():
            g0 = g_ref[0:1, :] * inv_d
            acc = jnp.sum((g0 - 1.0) ** 2) * inv_ls
            for j in range(1, n_terms):
                gr = g_ref[2 * j - 1:2 * j, :] * inv_d
                gi = g_ref[2 * j:2 * j + 1, :] * inv_d
                acc = acc + jnp.sum(gr * gr + gi * gi) * inv_ls
            r_ref[...] = jnp.zeros_like(r_ref) + acc

    return kernel


def _default_fft_length(K, d):
    # TODO(synk): hybra.utils.alias's exact default FFT length / normalization is
    # not in the spec; Ls defaults to max(K, 128) rounded up to lcm(d, 128) so the
    # frequency axis is lane-dense and exactly divisible by the decimation d.
    base = (d * 128) // math.gcd(d, 128)
    n = max(K, 128)
    return base * _cdiv(n, base)


def alias_pallas(kernels, d, Ls=None, diag_only=False):
    """Walnut-representation tightness/aliasing penalty of a hop-d filterbank."""
    M, K = kernels.shape
    d = int(d)
    Ls = int(Ls) if Ls is not None else _default_fft_length(K, d)

    # FFT has no Pallas equivalent -> XLA glue; real/imag are already f32 views.
    w_hat = jnp.fft.fft(kernels.astype(jnp.complex64), n=Ls, axis=-1)
    wr = jnp.real(w_hat)
    wi = jnp.imag(w_hat)

    # Tile over filters M: bounds VMEM (v7x: 64 MiB physical) and pipelines DMAs.
    mt_cap = max(8, min(256, (2 << 20) // max(Ls * 4, 1)) // 8 * 8)
    mt = min(_round_up(M, 8), mt_cap)
    M_pad = _round_up(_round_up(M, 8), mt)
    if M_pad != M:
        wr = jnp.pad(wr, ((0, M_pad - M), (0, 0)))     # zero filters contribute 0
        wi = jnp.pad(wi, ((0, M_pad - M), (0, 0)))
    n_m = M_pad // mt

    n_terms = 1 if diag_only else d
    n_rows = _round_up(2 * n_terms - 1, 8)

    r = pl.pallas_call(
        _make_alias_kernel(d, Ls, n_terms),
        out_shape=jax.ShapeDtypeStruct((1, 1), jnp.float32),
        grid_spec=pltpu.PrefetchScalarGridSpec(
            num_scalar_prefetch=0,
            grid=(n_m,),
            in_specs=[pl.BlockSpec((mt, Ls), lambda i: (i, 0)),
                      pl.BlockSpec((mt, Ls), lambda i: (i, 0))],
            out_specs=pl.BlockSpec((1, 1), lambda i: (0, 0)),
            scratch_shapes=[pltpu.VMEM((n_rows, Ls), jnp.float32)],
        ),
        compiler_params=pltpu.CompilerParams(
            dimension_semantics=("arbitrary",),
            vmem_limit_bytes=32 * 1024 * 1024),
    )(wr, wi)
    return r[0, 0]


# --------------------------------- module ------------------------------------
class MSETight:
    """JAX/Pallas port of hybra's MSETight loss module."""

    def __init__(self, beta: float = 0.0, fs: int = 16000, diag_only: bool = False):
        self.beta = beta
        self.fs = fs
        self.diag_only = diag_only

    def __call__(self, *args, **kwargs):
        return self.forward(*args, **kwargs)

    def forward(self, preds=None, target=None, kernels=None, d=None, Ls=None):
        if kernels is None:
            return mse_loss_pallas(preds, target)
        # Spec passes Ls=None to alias() regardless of the forward() argument.
        r = alias_pallas(kernels, d, None, diag_only=self.diag_only)
        if preds is None:
            # Spec returns r.item(); keep it on-device to avoid a host sync.
            return self.beta * r, r
        loss = mse_loss_pallas(preds, target)
        return loss, loss + self.beta * r, r


# ------------------------ pure-JAX reference (no Pallas) ----------------------
def _reference_forward(preds, target, kernels, d, beta, diag_only):
    loss = jnp.mean((preds.astype(jnp.float32) - target.astype(jnp.float32)) ** 2)

    M, K = kernels.shape
    Ls = _default_fft_length(K, int(d))
    w_hat = jnp.fft.fft(kernels.astype(jnp.complex64), n=Ls, axis=-1)
    diag = jnp.sum(jnp.abs(w_hat) ** 2, axis=0) / d
    r = jnp.mean((diag - 1.0) ** 2)
    if not diag_only:
        for j in range(1, int(d)):
            s = (j * Ls) // int(d)
            Gj = jnp.sum(w_hat * jnp.conj(jnp.roll(w_hat, s, axis=-1)), axis=0) / d
            r = r + jnp.mean(jnp.abs(Gj) ** 2)
    return loss, loss + beta * r, r


# ----------------------------------- main --------------------------------------
if __name__ == "__main__":
    Bsz, L = 2, 256          # batch of signals (lane-dense: L multiple of 128)
    M, K, d = 8, 16, 4       # filterbank: channels, taps, decimation
    beta = 0.1

    key = jax.random.PRNGKey(0)
    k1, k2 = jax.random.split(key)
    target = jax.random.normal(k1, (Bsz, L), dtype=jnp.float32)
    preds = target + 0.05 * jax.random.normal(k2, (Bsz, L), dtype=jnp.float32)

    # Deterministic ISAC-like (modulated Gaussian / Gabor) complex filter bank.
    n = np.arange(K)
    win = np.exp(-0.5 * ((n - (K - 1) / 2) / (K / 4)) ** 2)
    fc = (np.arange(M) + 0.5) / (2.0 * M)
    kern = win[None, :] * np.exp(2j * np.pi * fc[:, None] * (n[None, :] - K // 2))
    kern = kern / np.sqrt((np.abs(kern) ** 2).sum(-1, keepdims=True))
    kernels = jnp.asarray(kern, dtype=jnp.complex64)

    crit = MSETight(beta=beta, fs=16000, diag_only=False)

    # full branch: (loss, loss + beta*r, r)
    loss, loss_tight, r = crit(preds=preds, target=target, kernels=kernels, d=d, Ls=L)
    loss = jax.block_until_ready(loss)
    loss_tight = jax.block_until_ready(loss_tight)
    r = jax.block_until_ready(r)

    ref_loss, ref_total, ref_r = _reference_forward(preds, target, kernels, d, beta,
                                                    diag_only=False)
    np.testing.assert_allclose(float(loss), float(ref_loss), rtol=1e-4, atol=1e-5)
    np.testing.assert_allclose(float(loss_tight), float(ref_total), rtol=1e-4, atol=1e-5)
    np.testing.assert_allclose(float(r), float(ref_r), rtol=1e-4, atol=1e-5)

    # kernels=None branch: plain MSE
    only_loss = jax.block_until_ready(crit(preds=preds, target=target))
    np.testing.assert_allclose(float(only_loss),
                               float(jnp.mean((preds - target) ** 2)),
                               rtol=1e-4, atol=1e-6)

    print("KERNEL_OK")
</pallas_src>

<mosaic_0001>
module attributes {stable_mosaic.version = 11 : i64} {
  func.func @kernel(%arg0: i32, %arg1: memref<8x128xf32, #tpu.memory_space<vmem>>, %arg2: memref<8x128xf32, #tpu.memory_space<vmem>>, %arg3: memref<1x1xf32, #tpu.memory_space<vmem>>, %arg4: memref<8x128xf32, #tpu.memory_space<vmem>>) attributes {dimension_semantics = [#tpu.dimension_semantics<arbitrary>], iteration_bounds = array<i64: 1>, scalar_prefetch = 0 : i64, scratch_operands = 1 : i64, tpu.core_type = #tpu.core_type<tc>, window_params = [{transform_indices = @transform_0, window_bounds = array<i64: 8, 128>}, {transform_indices = @transform_1, window_bounds = array<i64: 8, 128>}, {pipeline_mode = #tpu.pipeline_mode<synchronous>, transform_indices = @transform_2, window_bounds = array<i64: 1, 1>}]} {
    %c0_i32 = arith.constant 0 : i32
    %0 = arith.cmpi eq, %arg0, %c0_i32 : i32
    %1 = arith.extui %0 : i1 to i32
    %c0_i32_0 = arith.constant 0 : i32
    %2 = arith.cmpi ne, %1, %c0_i32_0 : i32
    scf.if %2 {
      %cst_38 = arith.constant 0.000000e+00 : f32
      %64 = vector.broadcast %cst_38 : f32 to vector<8x128xf32>
      %c0_39 = arith.constant 0 : index
      %c0_40 = arith.constant 0 : index
      %65 = vector.load %arg4[%c0_39, %c0_40] : memref<8x128xf32, #tpu.memory_space<vmem>>, vector<8x128xf32>
      tpu.vector_store %arg4[%c0_39, %c0_40], %64 {strides = array<i32>} : memref<8x128xf32, #tpu.memory_space<vmem>>, vector<8x128xf32>,
      %cst_41 = arith.constant 0.000000e+00 : f32
      %66 = vector.broadcast %cst_41 : f32 to vector<1x1xf32>
      %c0_42 = arith.constant 0 : index
      %c0_43 = arith.constant 0 : index
      %67 = vector.load %arg3[%c0_42, %c0_43] : memref<1x1xf32, #tpu.memory_space<vmem>>, vector<1x1xf32>
      tpu.vector_store %arg3[%c0_42, %c0_43], %66 {strides = array<i32>} : memref<1x1xf32, #tpu.memory_space<vmem>>, vector<1x1xf32>,
    } else {
    }
    %c0 = arith.constant 0 : index
    %c0_1 = arith.constant 0 : index
    %3 = vector.load %arg1[%c0, %c0_1] : memref<8x128xf32, #tpu.memory_space<vmem>>, vector<8x128xf32>
    %c0_2 = arith.constant 0 : index
    %c0_3 = arith.constant 0 : index
    %4 = vector.load %arg2[%c0_2, %c0_3] : memref<8x128xf32, #tpu.memory_space<vmem>>, vector<8x128xf32>
    %cst = arith.constant 1.000000e+00 : f32
    %5 = vector.broadcast %cst : f32 to vector<1x8xf32>
    %c0_4 = arith.constant 0 : index
    %c0_5 = arith.constant 0 : index
    %6 = vector.load %arg4[%c0_4, %c0_5] : memref<8x128xf32, #tpu.memory_space<vmem>>, vector<1x128xf32>
    %7 = arith.mulf %3, %3 : vector<8x128xf32>
    %8 = arith.mulf %4, %4 : vector<8x128xf32>
    %9 = arith.addf %7, %8 : vector<8x128xf32>
    %cst_6 = arith.constant dense<0.000000e+00> : vector<1x128xf32>
    %10 = tpu.matmul %5, %9, %cst_6 {dimension_numbers = #tpu.dot_dimension_numbers<[1], [0], [0], [1], [0, 0, 1, 1], [], []>} : vector<1x8xf32>, vector<8x128xf32>, vector<1x128xf32> -> vector<1x128xf32>
    %11 = arith.addf %6, %10 : vector<1x128xf32>
    %c0_7 = arith.constant 0 : index
    %c0_8 = arith.constant 0 : index
    %12 = vector.load %arg4[%c0_7, %c0_8] : memref<8x128xf32, #tpu.memory_space<vmem>>, vector<1x128xf32>
    tpu.vector_store %arg4[%c0_7, %c0_8], %11 {strides = array<i32>} : memref<8x128xf32, #tpu.memory_space<vmem>>, vector<1x128xf32>,
    %c32_i32 = arith.constant 32 : i32
    %13 = tpu.dynamic_rotate %3 by %c32_i32 dim 1 : vector<8x128xf32>, i32 -> vector<8x128xf32>
    %c32_i32_9 = arith.constant 32 : i32
    %14 = tpu.dynamic_rotate %4 by %c32_i32_9 dim 1 : vector<8x128xf32>, i32 -> vector<8x128xf32>
    %c1 = arith.constant 1 : index
    %c0_10 = arith.constant 0 : index
    %15 = vector.load %arg4[%c1, %c0_10] : memref<8x128xf32, #tpu.memory_space<vmem>>, vector<1x128xf32>
    %16 = arith.mulf %3, %13 : vector<8x128xf32>
    %17 = arith.mulf %4, %14 : vector<8x128xf32>
    %18 = arith.addf %16, %17 : vector<8x128xf32>
    %cst_11 = arith.constant dense<0.000000e+00> : vector<1x128xf32>
    %19 = tpu.matmul %5, %18, %cst_11 {dimension_numbers = #tpu.dot_dimension_numbers<[1], [0], [0], [1], [0, 0, 1, 1], [], []>} : vector<1x8xf32>, vector<8x128xf32>, vector<1x128xf32> -> vector<1x128xf32>
    %20 = arith.addf %15, %19 : vector<1x128xf32>
    %c1_12 = arith.constant 1 : index
    %c0_13 = arith.constant 0 : index
    %21 = vector.load %arg4[%c1_12, %c0_13] : memref<8x128xf32, #tpu.memory_space<vmem>>, vector<1x128xf32>
    tpu.vector_store %arg4[%c1_12, %c0_13], %20 {strides = array<i32>} : memref<8x128xf32, #tpu.memory_space<vmem>>, vector<1x128xf32>,
    %c2 = arith.constant 2 : index
    %c0_14 = arith.constant 0 : index
    %22 = vector.load %arg4[%c2, %c0_14] : memref<8x128xf32, #tpu.memory_space<vmem>>, vector<1x128xf32>
    %23 = arith.mulf %4, %13 : vector<8x128xf32>
    %24 = arith.mulf %3, %14 : vector<8x128xf32>
    %25 = arith.subf %23, %24 : vector<8x128xf32>
    %cst_15 = arith.constant dense<0.000000e+00> : vector<1x128xf32>
    %26 = tpu.matmul %5, %25, %cst_15 {dimension_numbers = #tpu.dot_dimension_numbers<[1], [0], [0], [1], [0, 0, 1, 1], [], []>} : vector<1x8xf32>, vector<8x128xf32>, vector<1x128xf32> -> vector<1x128xf32>
    %27 = arith.addf %22, %26 : vector<1x128xf32>
    %c2_16 = arith.constant 2 : index
    %c0_17 = arith.constant 0 : index
    %28 = vector.load %arg4[%c2_16, %c0_17] : memref<8x128xf32, #tpu.memory_space<vmem>>, vector<1x128xf32>
    tpu.vector_store %arg4[%c2_16, %c0_17], %27 {strides = array<i32>} : memref<8x128xf32, #tpu.memory_space<vmem>>, vector<1x128xf32>,
    %c64_i32 = arith.constant 64 : i32
    %29 = tpu.dynamic_rotate %3 by %c64_i32 dim 1 : vector<8x128xf32>, i32 -> vector<8x128xf32>
    %c64_i32_18 = arith.constant 64 : i32
    %30 = tpu.dynamic_rotate %4 by %c64_i32_18 dim 1 : vector<8x128xf32>, i32 -> vector<8x128xf32>
    %c3 = arith.constant 3 : index
    %c0_19 = arith.constant 0 : index
    %31 = vector.load %arg4[%c3, %c0_19] : memref<8x128xf32, #tpu.memory_space<vmem>>, vector<1x128xf32>
    %32 = arith.mulf %3, %29 : vector<8x128xf32>
    %33 = arith.mulf %4, %30 : vector<8x128xf32>
    %34 = arith.addf %32, %33 : vector<8x128xf32>
    %cst_20 = arith.constant dense<0.000000e+00> : vector<1x128xf32>
    %35 = tpu.matmul %5, %34, %cst_20 {dimension_numbers = #tpu.dot_dimension_numbers<[1], [0], [0], [1], [0, 0, 1, 1], [], []>} : vector<1x8xf32>, vector<8x128xf32>, vector<1x128xf32> -> vector<1x128xf32>
    %36 = arith.addf %31, %35 : vector<1x128xf32>
    %c3_21 = arith.constant 3 : index
    %c0_22 = arith.constant 0 : index
    %37 = vector.load %arg4[%c3_21, %c0_22] : memref<8x128xf32, #tpu.memory_space<vmem>>, vector<1x128xf32>
    tpu.vector_store %arg4[%c3_21, %c0_22], %36 {strides = array<i32>} : memref<8x128xf32, #tpu.memory_space<vmem>>, vector<1x128xf32>,
    %c4 = arith.constant 4 : index
    %c0_23 = arith.constant 0 : index
    %38 = vector.load %arg4[%c4, %c0_23] : memref<8x128xf32, #tpu.memory_space<vmem>>, vector<1x128xf32>
    %39 = arith.mulf %4, %29 : vector<8x128xf32>
    %40 = arith.mulf %3, %30 : vector<8x128xf32>
    %41 = arith.subf %39, %40 : vector<8x128xf32>
    %cst_24 = arith.constant dense<0.000000e+00> : vector<1x128xf32>
    %42 = tpu.matmul %5, %41, %cst_24 {dimension_numbers = #tpu.dot_dimension_numbers<[1], [0], [0], [1], [0, 0, 1, 1], [], []>} : vector<1x8xf32>, vector<8x128xf32>, vector<1x128xf32> -> vector<1x128xf32>
    %43 = arith.addf %38, %42 : vector<1x128xf32>
    %c4_25 = arith.constant 4 : index
    %c0_26 = arith.constant 0 : index
    %44 = vector.load %arg4[%c4_25, %c0_26] : memref<8x128xf32, #tpu.memory_space<vmem>>, vector<1x128xf32>
    tpu.vector_store %arg4[%c4_25, %c0_26], %43 {strides = array<i32>} : memref<8x128xf32, #tpu.memory_space<vmem>>, vector<1x128xf32>,
    %c96_i32 = arith.constant 96 : i32
    %45 = tpu.dynamic_rotate %3 by %c96_i32 dim 1 : vector<8x128xf32>, i32 -> vector<8x128xf32>
    %c96_i32_27 = arith.constant 96 : i32
    %46 = tpu.dynamic_rotate %4 by %c96_i32_27 dim 1 : vector<8x128xf32>, i32 -> vector<8x128xf32>
    %c5 = arith.constant 5 : index
    %c0_28 = arith.constant 0 : index
    %47 = vector.load %arg4[%c5, %c0_28] : memref<8x128xf32, #tpu.memory_space<vmem>>, vector<1x128xf32>
    %48 = arith.mulf %3, %45 : vector<8x128xf32>
    %49 = arith.mulf %4, %46 : vector<8x128xf32>
    %50 = arith.addf %48, %49 : vector<8x128xf32>
    %cst_29 = arith.constant dense<0.000000e+00> : vector<1x128xf32>
    %51 = tpu.matmul %5, %50, %cst_29 {dimension_numbers = #tpu.dot_dimension_numbers<[1], [0], [0], [1], [0, 0, 1, 1], [], []>} : vector<1x8xf32>, vector<8x128xf32>, vector<1x128xf32> -> vector<1x128xf32>
    %52 = arith.addf %47, %51 : vector<1x128xf32>
    %c5_30 = arith.constant 5 : index
    %c0_31 = arith.constant 0 : index
    %53 = vector.load %arg4[%c5_30, %c0_31] : memref<8x128xf32, #tpu.memory_space<vmem>>, vector<1x128xf32>
    tpu.vector_store %arg4[%c5_30, %c0_31], %52 {strides = array<i32>} : memref<8x128xf32, #tpu.memory_space<vmem>>, vector<1x128xf32>,
    %c6 = arith.constant 6 : index
    %c0_32 = arith.constant 0 : index
    %54 = vector.load %arg4[%c6, %c0_32] : memref<8x128xf32, #tpu.memory_space<vmem>>, vector<1x128xf32>
    %55 = arith.mulf %4, %45 : vector<8x128xf32>
    %56 = arith.mulf %3, %46 : vector<8x128xf32>
    %57 = arith.subf %55, %56 : vector<8x128xf32>
    %cst_33 = arith.constant dense<0.000000e+00> : vector<1x128xf32>
    %58 = tpu.matmul %5, %57, %cst_33 {dimension_numbers = #tpu.dot_dimension_numbers<[1], [0], [0], [1], [0, 0, 1, 1], [], []>} : vector<1x8xf32>, vector<8x128xf32>, vector<1x128xf32> -> vector<1x128xf32>
    %59 = arith.addf %54, %58 : vector<1x128xf32>
    %c6_34 = arith.constant 6 : index
    %c0_35 = arith.constant 0 : index
    %60 = vector.load %arg4[%c6_34, %c0_35] : memref<8x128xf32, #tpu.memory_space<vmem>>, vector<1x128xf32>
    tpu.vector_store %arg4[%c6_34, %c0_35], %59 {strides = array<i32>} : memref<8x128xf32, #tpu.memory_space<vmem>>, vector<1x128xf32>,
    %c0_i32_36 = arith.constant 0 : i32
    %61 = arith.cmpi eq, %arg0, %c0_i32_36 : i32
    %62 = arith.extui %61 : i1 to i32
    %c0_i32_37 = arith.constant 0 : i32
    %63 = arith.cmpi ne, %62, %c0_i32_37 : i32
    scf.if %63 {
      %c0_38 = arith.constant 0 : index
      %c0_39 = arith.constant 0 : index
      %64 = vector.load %arg4[%c0_38, %c0_39] : memref<8x128xf32, #tpu.memory_space<vmem>>, vector<1x128xf32>
      %cst_40 = arith.constant 2.500000e-01 : f32
      %65 = vector.broadcast %cst_40 : f32 to vector<1x128xf32>
      %66 = arith.mulf %64, %65 : vector<1x128xf32>
      %cst_41 = arith.constant 1.000000e+00 : f32
      %67 = vector.broadcast %cst_41 : f32 to vector<1x128xf32>
      %68 = arith.subf %66, %67 : vector<1x128xf32>
      %69 = arith.mulf %68, %68 : vector<1x128xf32>
      %70 = vector.shape_cast %69 : vector<1x128xf32> to vector<1x1x128xf32>
      %cst_42 = arith.constant dense<0.000000e+00> : vector<1xf32>
      %71 = vector.multi_reduction <add>, %70, %cst_42 [1, 2] : vector<1x1x128xf32> to vector<1xf32>
      %72 = vector.shape_cast %71 : vector<1xf32> to vector<1x1x1xf32>
      %73 = vector.extract %72[0, 0, 0] : f32 from vector<1x1x1xf32>
      %cst_43 = arith.constant 7.812500e-03 : f32
      %74 = arith.mulf %73, %cst_43 : f32
      %c1_44 = arith.constant 1 : index
      %c0_45 = arith.constant 0 : index
      %75 = vector.load %arg4[%c1_44, %c0_45] : memref<8x128xf32, #tpu.memory_space<vmem>>, vector<1x128xf32>
      %cst_46 = arith.constant 2.500000e-01 : f32
      %76 = vector.broadcast %cst_46 : f32 to vector<1x128xf32>
      %77 = arith.mulf %75, %76 : vector<1x128xf32>
      %c2_47 = arith.constant 2 : index
      %c0_48 = arith.constant 0 : index
      %78 = vector.load %arg4[%c2_47, %c0_48] : memref<8x128xf32, #tpu.memory_space<vmem>>, vector<1x128xf32>
      %cst_49 = arith.constant 2.500000e-01 : f32
      %79 = vector.broadcast %cst_49 : f32 to vector<1x128xf32>
      %80 = arith.mulf %78, %79 : vector<1x128xf32>
      %81 = arith.mulf %77, %77 : vector<1x128xf32>
      %82 = arith.mulf %80, %80 : vector<1x128xf32>
      %83 = arith.addf %81, %82 : vector<1x128xf32>
      %84 = vector.shape_cast %83 : vector<1x128xf32> to vector<1x1x128xf32>
      %cst_50 = arith.constant dense<0.000000e+00> : vector<1xf32>
      %85 = vector.multi_reduction <add>, %84, %cst_50 [1, 2] : vector<1x1x128xf32> to vector<1xf32>
      %86 = vector.shape_cast %85 : vector<1xf32> to vector<1x1x1xf32>
      %87 = vector.extract %86[0, 0, 0] : f32 from vector<1x1x1xf32>
      %cst_51 = arith.constant 7.812500e-03 : f32
      %88 = arith.mulf %87, %cst_51 : f32
      %89 = arith.addf %74, %88 : f32
      %c3_52 = arith.constant 3 : index
      %c0_53 = arith.constant 0 : index
      %90 = vector.load %arg4[%c3_52, %c0_53] : memref<8x128xf32, #tpu.memory_space<vmem>>, vector<1x128xf32>
      %cst_54 = arith.constant 2.500000e-01 : f32
      %91 = vector.broadcast %cst_54 : f32 to vector<1x128xf32>
      %92 = arith.mulf %90, %91 : vector<1x128xf32>
      %c4_55 = arith.constant 4 : index
      %c0_56 = arith.constant 0 : index
      %93 = vector.load %arg4[%c4_55, %c0_56] : memref<8x128xf32, #tpu.memory_space<vmem>>, vector<1x128xf32>
      %cst_57 = arith.constant 2.500000e-01 : f32
      %94 = vector.broadcast %cst_57 : f32 to vector<1x128xf32>
      %95 = arith.mulf %93, %94 : vector<1x128xf32>
      %96 = arith.mulf %92, %92 : vector<1x128xf32>
      %97 = arith.mulf %95, %95 : vector<1x128xf32>
      %98 = arith.addf %96, %97 : vector<1x128xf32>
      %99 = vector.shape_cast %98 : vector<1x128xf32> to vector<1x1x128xf32>
      %cst_58 = arith.constant dense<0.000000e+00> : vector<1xf32>
      %100 = vector.multi_reduction <add>, %99, %cst_58 [1, 2] : vector<1x1x128xf32> to vector<1xf32>
      %101 = vector.shape_cast %100 : vector<1xf32> to vector<1x1x1xf32>
      %102 = vector.extract %101[0, 0, 0] : f32 from vector<1x1x1xf32>
      %cst_59 = arith.constant 7.812500e-03 : f32
      %103 = arith.mulf %102, %cst_59 : f32
      %104 = arith.addf %89, %103 : f32
      %c5_60 = arith.constant 5 : index
      %c0_61 = arith.constant 0 : index
      %105 = vector.load %arg4[%c5_60, %c0_61] : memref<8x128xf32, #tpu.memory_space<vmem>>, vector<1x128xf32>
      %cst_62 = arith.constant 2.500000e-01 : f32
      %106 = vector.broadcast %cst_62 : f32 to vector<1x128xf32>
      %107 = arith.mulf %105, %106 : vector<1x128xf32>
      %c6_63 = arith.constant 6 : index
      %c0_64 = arith.constant 0 : index
      %108 = vector.load %arg4[%c6_63, %c0_64] : memref<8x128xf32, #tpu.memory_space<vmem>>, vector<1x128xf32>
      %cst_65 = arith.constant 2.500000e-01 : f32
      %109 = vector.broadcast %cst_65 : f32 to vector<1x128xf32>
      %110 = arith.mulf %108, %109 : vector<1x128xf32>
      %111 = arith.mulf %107, %107 : vector<1x128xf32>
      %112 = arith.mulf %110, %110 : vector<1x128xf32>
      %113 = arith.addf %111, %112 : vector<1x128xf32>
      %114 = vector.shape_cast %113 : vector<1x128xf32> to vector<1x1x128xf32>
      %cst_66 = arith.constant dense<0.000000e+00> : vector<1xf32>
      %115 = vector.multi_reduction <add>, %114, %cst_66 [1, 2] : vector<1x1x128xf32> to vector<1xf32>
      %116 = vector.shape_cast %115 : vector<1xf32> to vector<1x1x1xf32>
      %117 = vector.extract %116[0, 0, 0] : f32 from vector<1x1x1xf32>
      %cst_67 = arith.constant 7.812500e-03 : f32
      %118 = arith.mulf %117, %cst_67 : f32
      %119 = arith.addf %104, %118 : f32
      %cst_68 = arith.constant 0.000000e+00 : f32
      %120 = vector.broadcast %cst_68 : f32 to vector<1x1xf32>
      %121 = vector.broadcast %119 : f32 to vector<1x1xf32>
      %122 = arith.addf %120, %121 : vector<1x1xf32>
      %c0_69 = arith.constant 0 : index
      %c0_70 = arith.constant 0 : index
      %123 = vector.load %arg3[%c0_69, %c0_70] : memref<1x1xf32, #tpu.memory_space<vmem>>, vector<1x1xf32>
      tpu.vector_store %arg3[%c0_69, %c0_70], %122 {strides = array<i32>} : memref<1x1xf32, #tpu.memory_space<vmem>>, vector<1x1xf32>,
    } else {
    }
    return
  }
  func.func @transform_0(%arg0: i32) -> (i32, i32) {
    %c0_i32 = arith.constant 0 : i32
    %c0_i32_0 = arith.constant 0 : i32
    return %arg0, %c0_i32 : i32, i32
  }
  func.func @transform_1(%arg0: i32) -> (i32, i32) {
    %c0_i32 = arith.constant 0 : i32
    %c0_i32_0 = arith.constant 0 : i32
    return %arg0, %c0_i32 : i32, i32
  }
  func.func @transform_2(%arg0: i32) -> (i32, i32) {
    %c0_i32 = arith.constant 0 : i32
    %c0_i32_0 = arith.constant 0 : i32
    %c0_i32_1 = arith.constant 0 : i32
    return %c0_i32, %c0_i32_0 : i32, i32
  }
}

</mosaic_0001>

<bundles_post_ra>
// kernel: tpu_custom_call.1
= control target key start
LH: loop header
LB: loop body
LE: loop exit
PB: predicated region body
PF: predicated region fallthrough
CT: control target
= control target key end

     0   :  { %7 = vsyncpa [#allocation4], 0  ;;  %s898_s0 = inlined_call_operand.hbm [shape: f32[8,128], index: 0, kind: input, shape index: {}]   ;;  %s899_s1 = inlined_call_operand.hbm [shape: f32[8,128], index: 1, kind: input, shape index: {}]   ;;  %s900_s2 = inlined_call_operand.hbm [shape: f32[1,1], index: 2, kind: output, shape index: {}]  }
   0x1   :  { %8 = vsyncpa [#allocation7], 0 }
   0x2   :  { %9 = vsyncpa [#allocation5], 0  ;;  %s829_s9 = smov [#allocation3]   ;;  %s830_s11 = smov [#allocation6]  }
   0x3   :  { %s16_s10 = sshll.u32 %s829_s9, 4  ;;  %s26_s12 = sshll.u32 %s830_s11, 4  ;;  %s17_s10 = int_to_ptr.vmem [resolvable:$true] %s16_s10  ;;  %s27_s12 = int_to_ptr.vmem [resolvable:$true] %s26_s12 }
   0x4   :  { %s771_s13 = scalar_lea.vmem %s17_s10, 128  ;;  %p776_p1 = scmp.lt.s32.totalorder %s17_s10, %s17_s10 }
   0x5   :  { %p772_p0 = scmp.ne.s32.totalorder %s17_s10, %s771_s13  ;;  %p777_p2 = scmp.lt.s32.totalorder %s771_s13, %s771_s13 }
   0x7   :  { %p778_p3 = por %p777_p2, %p776_p1 }
   0x9   :  { %p779_p4 = pnand %p778_p3, %p772_p0 }
   0xb   :  { %782 = shalt.err (!%p779_p4)
}
   0xc   :  { %19 = dma.hbm_to_vmem [thread:$0]  %s898_s0, 128, %s17_s10, [#allocation4]  }
   0xd   :  { %s791_s16 = scalar_lea.vmem %s27_s12, 128  ;;  %p796_p6 = scmp.lt.s32.totalorder %s27_s12, %s27_s12 }
   0xe   :  { %p792_p5 = scmp.ne.s32.totalorder %s27_s12, %s791_s16  ;;  %p797_p7 = scmp.lt.s32.totalorder %s791_s16, %s791_s16 }
  0x10   :  { %p798_p8 = por %p797_p7, %p796_p6 }
  0x12   :  { %p799_p9 = pnand %p798_p8, %p792_p5 }
  0x14   :  { %802 = shalt.err (!%p799_p9)
}
  0x15   :  { %29 = dma.hbm_to_vmem [thread:$0]  %s899_s1, 128, %s27_s12, [#allocation7]  }
  0x16   :  { %823 = dma.done.wait [#allocation4], 128  }
  0x17   :  { %824 = vsyncadd [#allocation4], 4294967168 }
  0x18   :  { %825 = dma.done.wait [#allocation7], 128  }
  0x19   :  { %826 = vsyncadd [#allocation7], 4294967168  ;;  %v831_v0 = vmov 0.0   ;;  %vm832_vm0 = vmmov 0   ;;  %v43_v1 = vld [vmem:[#allocation3] sm:$0xff]  ;;  %v44_v2 = vld [vmem:[#allocation6] sm:$0xff] }
  0x1a   :  { %711 = vmatprep.subr.mxu0 %v831_v0  ;;  %40 = vst [vmem:[#allocation2] sm:$0xff] %v831_v0  ;;  %713 = vmatprep.mubr.msk.f32.mxu0 %vm832_vm0, %v831_v0  ;;  %s833_s0 = smov 64   ;;  %s834_s1 = smov 32   ;;  %v46_v3 = vmul.f32 %v43_v1, %v43_v1  ;;  %v47_v4 = vmul.f32 %v44_v2, %v44_v2  ;;  %vm49_vm1 = vcmask 64512   ;;  %v835_v6 = vmov 1.0  }
  0x1b   :  { %716 = vmatprep.subr.mxu1 %v831_v0  ;;  %718 = vmatprep.mubr.msk.f32.mxu1 %vm832_vm0, %v831_v0  ;;  %s836_s19 = smov 96   ;;  %vm600_vm2 = vcmask 1040384   ;;  %vm41_vm3 = vcmask 0   ;;  %s837_s28 = smov [#allocation8]  }
  0x1c   :  { %281 = vrot.lane.b32.xlu1 %v43_v1, %s833_s0  ;;  %125 = vrot.lane.b32.xlu0 %v43_v1, %s834_s1  ;;  %v48_v5 = vadd.f32 %v47_v4, %v46_v3  ;;  %42 = vst.msk [vmem:[#allocation8] sm:$0x1] %vm41_vm3, %v831_v0  ;;  %s679_s29 = sshll.u32 %s837_s28, 4  ;;  %s680_s29 = int_to_ptr.vmem [resolvable:$true] %s679_s29 }
  0x1d   :  { %s803_s5 = scalar_lea.vmem %s680_s29, 16  ;;  %s807_s6 = scalar_lea.vmem %s680_s29, 32 }
  0x1e   :  { %712 = vmatpush3.msra.mxu0 %v48_v5  ;;  %p804_p10 = scmp.ne.s32.totalorder %s680_s29, %s803_s5  ;;  %p808_p11 = scmp.lt.s32.totalorder %s680_s29, %s680_s29 }
  0x1f   :  { %714 = vmatmul.mubr.msk.f32.vlgmr.msra.gmra.mxu0 %vm49_vm1, %v835_v6  ;;  %721 = vmatprep.subr.mxu0 %v831_v0  ;;  %p809_p12 = scmp.lt.s32.totalorder %s807_s6, %s803_s5 }
  0x20   :  { %283 = vrot.lane.b32.xlu1 %v44_v2, %s833_s0  ;;  %127 = vrot.lane.b32.xlu0 %v44_v2, %s834_s1 }
  0x21   :  { %723 = vmatprep.mubr.msk.f32.mxu0 %vm832_vm0, %v831_v0  ;;  %v45_v31 = vld [vmem:[#allocation2] sm:$0x1]  ;;  %v129_v40 = vld [vmem:[#allocation2 + $0x1] sm:$0x1]  ;;  %v205_v41 = vld [vmem:[#allocation2 + $0x2] sm:$0x1]  ;;  %p810_p13 = por %p809_p12, %p808_p11 }
  0x22   :  { %v285_v48 = vld [vmem:[#allocation2 + $0x3] sm:$0x1]  ;;  %v361_v49 = vld [vmem:[#allocation2 + $0x4] sm:$0x1]  ;;  %v441_v56 = vld [vmem:[#allocation2 + $0x5] sm:$0x1] }
  0x23   :  { %v517_v57 = vld [vmem:[#allocation2 + $0x6] sm:$0x1]  ;;  %p811_p0 = pnand %p810_p13, %p804_p10 }
  0x24   :  { %439 = vrot.lane.b32.xlu1 %v44_v2, %s836_s19  ;;  %437 = vrot.lane.b32.xlu0 %v43_v1, %s836_s19 }
  0x8e   :  { %v282_v7 = vpop.permute.xlu1 %281  ;;  %v126_v8 = vpop.permute.xlu0 %125 }
  0x8f   :  { %v130_v11 = vmul.f32 %v126_v8, %v43_v1  ;;  %v206_v12 = vmul.f32 %v126_v8, %v44_v2  ;;  %v286_v15 = vmul.f32 %v282_v7, %v43_v1  ;;  %v362_v16 = vmul.f32 %v282_v7, %v44_v2 }
  0x92   :  { %v284_v9 = vpop.permute.xlu1 %283  ;;  %v128_v10 = vpop.permute.xlu0 %127 }
  0x93   :  { %v131_v13 = vmul.f32 %v128_v10, %v44_v2  ;;  %v207_v14 = vmul.f32 %v128_v10, %v43_v1  ;;  %v287_v17 = vmul.f32 %v284_v9, %v44_v2  ;;  %v363_v18 = vmul.f32 %v284_v9, %v43_v1 }
  0x95   :  { %v208_v19 = vsub.f32 %v206_v12, %v207_v14  ;;  %v132_v20 = vadd.f32 %v131_v13, %v130_v11  ;;  %v288_v26 = vadd.f32 %v287_v17, %v286_v15  ;;  %v364_v27 = vsub.f32 %v362_v16, %v363_v18 }
  0x96   :  { %v440_v21 = vpop.permute.xlu1 %439  ;;  %v438_v22 = vpop.permute.xlu0 %437 }
  0x97   :  { %717 = vmatpush3.msra.mxu1 %v132_v20  ;;  %722 = vmatpush3.msra.mxu0 %v208_v19  ;;  %v443_v23 = vmul.f32 %v440_v21, %v44_v2  ;;  %v519_v24 = vmul.f32 %v440_v21, %v43_v1  ;;  %v442_v25 = vmul.f32 %v438_v22, %v43_v1 }
  0x98   :  { %719 = vmatmul.mubr.msk.f32.vlgmr.msra.gmra.mxu1 %vm49_vm1, %v835_v6  ;;  %724 = vmatmul.mubr.msk.f32.vlgmr.msra.gmra.mxu0 %vm49_vm1, %v835_v6  ;;  %v518_v28 = vmul.f32 %v438_v22, %v44_v2 }
  0x99   :  { %726 = vmatprep.subr.mxu1 %v831_v0  ;;  %731 = vmatprep.subr.mxu0 %v831_v0  ;;  %v444_v29 = vadd.f32 %v443_v23, %v442_v25 }
  0x9a   :  { %727 = vmatpush3.msra.mxu1 %v288_v26  ;;  %732 = vmatpush3.msra.mxu0 %v364_v27  ;;  %v520_v30 = vsub.f32 %v518_v28, %v519_v24 }
  0x9b   :  { %728 = vmatprep.mubr.msk.f32.mxu1 %vm832_vm0, %v831_v0  ;;  %733 = vmatprep.mubr.msk.f32.mxu0 %vm832_vm0, %v831_v0 }
  0x9c   :  { %729 = vmatmul.mubr.msk.f32.vlgmr.msra.gmra.mxu1 %vm49_vm1, %v835_v6  ;;  %734 = vmatmul.mubr.msk.f32.vlgmr.msra.gmra.mxu0 %vm49_vm1, %v835_v6 }
  0x9d   :  { %736 = vmatprep.subr.mxu1 %v831_v0  ;;  %741 = vmatprep.subr.mxu0 %v831_v0 }
  0x9e   :  { %737 = vmatpush3.msra.mxu1 %v444_v29  ;;  %738 = vmatprep.mubr.msk.f32.mxu1 %vm832_vm0, %v831_v0 }
  0x9f   :  { %742 = vmatpush3.msra.mxu0 %v520_v30  ;;  %743 = vmatprep.mubr.msk.f32.mxu0 %vm832_vm0, %v831_v0 }
  0xa0   :  { %739 = vmatmul.mubr.msk.f32.vlgmr.msra.gmra.mxu1 %vm49_vm1, %v835_v6  ;;  %744 = vmatmul.mubr.msk.f32.vlgmr.msra.gmra.mxu0 %vm49_vm1, %v835_v6 }
  0xdf   :  { %v119_v32 = vpop.f32.mrf.mxu0 }
  0xe0   :  { %v123_v33 = vadd.f32 %v119_v32, %v45_v31 }
  0xe1   :  { %v715_v34 = vpop.f32.mrf.mxu0 }
  0xe2   :  { %124 = vst [vmem:[#allocation2] sm:$0x1] %v123_v33 }
  0xe9   :  { %v596_v35 = vld [vmem:[#allocation2] sm:$0x1] }
  0xea   :  { %v597_v36 = vmul.f32 0.25, %v596_v35 }
  0xec   :  { %v696_v37 = vadd.f32 -1.0, %v597_v36 }
  0xee   :  { %v599_v38 = vmul.f32 %v696_v37, %v696_v37 }
  0xf0   :  { %v601_v39 = vsel %vm600_vm2, %v599_v38, 0.0 }
  0xf1   :  { %602 = vadd.xlane.f32.xlu0 %v601_v39 }
 0x158   :  { %v199_v42 = vpop.f32.mrf.mxu1  ;;  %v275_v43 = vpop.f32.mrf.mxu0 }
 0x159   :  { %v203_v44 = vadd.f32 %v199_v42, %v129_v40  ;;  %v279_v45 = vadd.f32 %v275_v43, %v205_v41 }
 0x15a   :  { %v720_v46 = vpop.f32.mrf.mxu1  ;;  %v725_v47 = vpop.f32.mrf.mxu0 }
 0x15b   :  { %204 = vst [vmem:[#allocation2 + $0x1] sm:$0x1] %v203_v44  ;;  %280 = vst [vmem:[#allocation2 + $0x2] sm:$0x1] %v279_v45 }
 0x15c   :  { %v355_v50 = vpop.f32.mrf.mxu1  ;;  %v431_v51 = vpop.f32.mrf.mxu0 }
 0x15d   :  { %v359_v52 = vadd.f32 %v355_v50, %v285_v48  ;;  %v435_v53 = vadd.f32 %v431_v51, %v361_v49 }
 0x15e   :  { %v730_v54 = vpop.f32.mrf.mxu1  ;;  %v735_v55 = vpop.f32.mrf.mxu0 }
 0x15f   :  { %360 = vst [vmem:[#allocation2 + $0x3] sm:$0x1] %v359_v52  ;;  %436 = vst [vmem:[#allocation2 + $0x4] sm:$0x1] %v435_v53 }
 0x160   :  { %v511_v58 = vpop.f32.mrf.mxu1  ;;  %v587_v59 = vpop.f32.mrf.mxu0 }
 0x161   :  { %v515_v60 = vadd.f32 %v511_v58, %v441_v56  ;;  %v591_v61 = vadd.f32 %v587_v59, %v517_v57 }
 0x162   :  { %v740_v62 = vpop.f32.mrf.mxu1  ;;  %v745_v63 = vpop.f32.mrf.mxu0  ;;  %v612_v1 = vld [vmem:[#allocation2 + $0x1] sm:$0x1]  ;;  %v614_v2 = vld [vmem:[#allocation2 + $0x2] sm:$0x1] }
 0x163   :  { %516 = vst [vmem:[#allocation2 + $0x5] sm:$0x1] %v515_v60  ;;  %592 = vst [vmem:[#allocation2 + $0x6] sm:$0x1] %v591_v61  ;;  %v613_v3 = vmul.f32 0.25, %v612_v1  ;;  %v615_v4 = vmul.f32 0.25, %v614_v2 }
 0x165   :  { %v616_v5 = vmul.f32 %v613_v3, %v613_v3  ;;  %v617_v6 = vmul.f32 %v615_v4, %v615_v4 }
 0x166   :  { %v631_v7 = vld [vmem:[#allocation2 + $0x3] sm:$0x1]  ;;  %v633_v8 = vld [vmem:[#allocation2 + $0x4] sm:$0x1] }
 0x167   :  { %v618_v9 = vadd.f32 %v617_v6, %v616_v5  ;;  %v632_v10 = vmul.f32 0.25, %v631_v7  ;;  %v634_v11 = vmul.f32 0.25, %v633_v8 }
 0x169   :  { %v619_v12 = vsel %vm600_vm2, %v618_v9, 0.0  ;;  %v635_v13 = vmul.f32 %v632_v10, %v632_v10  ;;  %v636_v14 = vmul.f32 %v634_v11, %v634_v11 }
 0x16a   :  { %620 = vadd.xlane.f32.xlu1 %v619_v12  ;;  %v650_v15 = vld [vmem:[#allocation2 + $0x5] sm:$0x1]  ;;  %v652_v16 = vld [vmem:[#allocation2 + $0x6] sm:$0x1] }
 0x16b   :  { %v637_v17 = vadd.f32 %v636_v14, %v635_v13  ;;  %v651_v18 = vmul.f32 0.25, %v650_v15  ;;  %v653_v19 = vmul.f32 0.25, %v652_v16 }
 0x16d   :  { %v638_v20 = vsel %vm600_vm2, %v637_v17, 0.0  ;;  %v654_v21 = vmul.f32 %v651_v18, %v651_v18  ;;  %v655_v22 = vmul.f32 %v653_v19, %v653_v19 }
 0x16e   :  { %639 = vadd.xlane.f32.xlu0 %v638_v20 }
 0x16f   :  { %v656_v23 = vadd.f32 %v655_v22, %v654_v21 }
 0x171   :  { %v657_v24 = vsel %vm600_vm2, %v656_v23, 0.0 }
 0x172   :  { %658 = vadd.xlane.f32.xlu0 %v657_v24 }
 0x17a   :  { %v603_v25 = vpop.xlane.xlu0 %602 }
 0x17b   :  { %v604_v26 = vrot.slane %v603_v25, 4 }
 0x17d   :  { %v605_v27 = vadd.f32 %v604_v26, %v603_v25 }
 0x17f   :  { %v606_v28 = vrot.slane %v605_v27, 2 }
 0x181   :  { %v607_v29 = vadd.f32 %v606_v28, %v605_v27 }
 0x183   :  { %v608_v30 = vrot.slane %v607_v29, 1 }
 0x185   :  { %v609_v31 = vadd.f32 %v608_v30, %v607_v29 }
 0x187   :  { %746 = vpush %v609_v31 }
 0x1b8   :  { %s747_s20 = spop %746 }
 0x1b9   :  { %s611_s23 = smul.f32 0.0078125, %s747_s20 }
 0x1f3   :  { %v621_v32 = vpop.xlane.xlu1 %620 }
 0x1f4   :  { %v622_v33 = vrot.slane %v621_v32, 4 }
 0x1f6   :  { %v623_v34 = vadd.f32 %v622_v33, %v621_v32 }
 0x1f7   :  { %v640_v35 = vpop.xlane.xlu0 %639 }
 0x1f8   :  { %v624_v36 = vrot.slane %v623_v34, 2  ;;  %v641_v37 = vrot.slane %v640_v35, 4 }
 0x1fa   :  { %v625_v38 = vadd.f32 %v624_v36, %v623_v34  ;;  %v642_v39 = vadd.f32 %v641_v37, %v640_v35 }
 0x1fb   :  { %v659_v40 = vpop.xlane.xlu0 %658 }
 0x1fc   :  { %v643_v41 = vrot.slane %v642_v39, 2  ;;  %v660_v42 = vrot.slane %v659_v40, 4  ;;  %v626_v43 = vrot.slane %v625_v38, 1 }
 0x1fe   :  { %v661_v44 = vadd.f32 %v660_v42, %v659_v40  ;;  %v627_v45 = vadd.f32 %v626_v43, %v625_v38  ;;  %v644_v46 = vadd.f32 %v643_v41, %v642_v39 }
 0x200   :  { %v662_v47 = vrot.slane %v661_v44, 2  ;;  %748 = vpush %v627_v45  ;;  %v645_v48 = vrot.slane %v644_v46, 1 }
 0x202   :  { %v663_v49 = vadd.f32 %v662_v47, %v661_v44  ;;  %v646_v0 = vadd.f32 %v645_v48, %v644_v46 }
 0x204   :  { %750 = vpush %v646_v0  ;;  %v664_v50 = vrot.slane %v663_v49, 1 }
 0x206   :  { %v665_v51 = vadd.f32 %v664_v50, %v663_v49 }
 0x208   :  { %752 = vpush %v665_v51 }
 0x231   :  { %s749_s21 = spop %748 }
 0x232   :  { %s629_s22 = smul.f32 0.0078125, %s749_s21 }
 0x234   :  { %s630_s26 = sadd.f32 %s629_s22, %s611_s23 }
 0x235   :  { %s751_s24 = spop %750 }
 0x236   :  { %s648_s25 = smul.f32 0.0078125, %s751_s24 }
 0x238   :  { %s649_s30 = sadd.f32 %s648_s25, %s630_s26 }
 0x239   :  { %s753_s27 = spop %752 }
 0x23a   :  { %s667_s3 = smul.f32 0.0078125, %s753_s27 }
 0x23c   :  { %s668_s4 = sadd.f32 %s667_s3, %s649_s30 }
 0x23e   :  { %v669_v52 = vstv %s668_s4 }
 0x23f   :  { %672 = vst.msk [vmem:[#allocation8] sm:$0x1] %vm41_vm3, %v669_v52 }
 0x240   :  { %814 = shalt.err (!%p811_p0)
}
 0x241   :  { %682 = dma.vmem_to_hbm [thread:$0]  %s680_s29, 16, %s900_s2, [#allocation5]  }
 0x242   :  { %827 = dma.done.wait [#allocation5], 16  }
 0x243   :  { %828 = vsyncadd [#allocation5], 4294967280 }
 0x244   :  { %686 = vsyncpa [#allocation4], 1 }
 0x245   :  { %687 = vsyncpa [#allocation7], 1 }
 0x246   :  { %688 = vsyncpa [#allocation5], 1 }

</bundles_post_ra>
